<compile_context>
chip_gen: v5e
topology: v5e:2x2
jax: 0.10.0
libtpu: 0.0.40
codegen_flags: <defaults>
</compile_context>

<pallas_src>
import jax
import jax.numpy as jnp
from jax.experimental import pallas as pl
from jax.experimental.pallas import tpu as pltpu


# ----------------------------------------------------------------------------------
# Kernels
# ----------------------------------------------------------------------------------
def _linear_kernel_acc(x_ref, w_ref, b_ref, o_ref, acc_ref):
    """One (tm, tk) x (tk, N) MXU step with f32 accumulation over the K grid axis."""
    k = pl.program_id(1)

    @pl.when(k == 0)
    def _():
        acc_ref[...] = jnp.zeros_like(acc_ref)

    acc_ref[...] += jnp.dot(
        x_ref[...], w_ref[...], preferred_element_type=jnp.float32
    )

    @pl.when(k == pl.num_programs(1) - 1)
    def _():
        o_ref[...] = (acc_ref[...] + b_ref[...]).astype(o_ref.dtype)


def _linear_kernel_single(x_ref, w_ref, b_ref, o_ref):
    """Whole-K in one block: no scratch accumulator needed."""
    o_ref[...] = (
        jnp.dot(x_ref[...], w_ref[...], preferred_element_type=jnp.float32)
        + b_ref[...]
    ).astype(o_ref.dtype)


# ----------------------------------------------------------------------------------
# Tile selection
# ----------------------------------------------------------------------------------
def _pick_tm(b):
    """M tile: full batch when small (full-dim block is always legal), else a 128/256 tile."""
    if b <= 256:
        return b
    for cand in (256, 128, 64, 32, 16, 8):
        if b % cand == 0:
            return cand
    return b  # fall back to one big M block (legal, just larger VMEM blocks)


def _pick_tk(K, tm, N, elem_bytes, vmem_budget_bytes=12 << 20):
    """Largest K tile (multiple of 128, dividing K) whose double-buffered blocks fit budget."""
    if K % 128 != 0:
        return K  # full-dim block is always a legal block shape
    tk = (K // 128) * 128
    while tk >= 128:
        if K % tk == 0:
            # double-buffered activation + weight blocks
            blk_bytes = 2 * (tm * tk + tk * N) * elem_bytes
            if blk_bytes <= vmem_budget_bytes:
                return tk
        tk -= 128
    return 128


# ----------------------------------------------------------------------------------
# Wrapper:  y = x.view(B, -1) @ W.T + b
# ----------------------------------------------------------------------------------
def classifier_forward(x, weight, bias, *, tm=None, tk=None):
    """Pallas equivalent of ClassifierModule's  flatten + nn.Linear.

    x:      (B, C, H, W)  feature map produced by the backbone `m`
    weight: (num_classes, total_neurons)   -- torch nn.Linear layout
    bias:   (num_classes,)
    """
    # TODO(synk): the backbone `self.m` is an arbitrary user submodule; it is treated as
    # external here and only the flatten + Linear head is implemented as a Pallas kernel.
    b = x.shape[0]

    # Flatten: metadata-only reshape (free), lane-dense (B, C*H*W) 2-D view.
    x2 = x.reshape(b, -1)
    K = x2.shape[1]
    N = weight.shape[0]

    # One-time cheap transpose outside the hot loop so the kernel is a plain
    # (tm, tk) @ (tk, N) MXU matmul.
    wt = weight.T                   # (K, N)
    b2 = bias.reshape(1, N)         # 2-D block for VMEM

    elem_bytes = jnp.dtype(x.dtype).itemsize

    if tm is None:
        tm = _pick_tm(b)
    assert b % tm == 0, f"batch {b} must be divisible by tm {tm}"

    if tk is None:
        tk = _pick_tk(K, tm, N, elem_bytes)
    assert K % tk == 0, f"K {K} must be divisible by tk {tk}"

    grid_m = b // tm
    grid_k = K // tk

    out_shape = jax.ShapeDtypeStruct((b, N), x.dtype)

    if grid_k == 1:
        # Whole reduction fits in one block: scratch-free fast path.
        return pl.pallas_call(
            _linear_kernel_single,
            out_shape=out_shape,
            grid_spec=pltpu.PrefetchScalarGridSpec(
                num_scalar_prefetch=0,
                grid=(grid_m,),
                in_specs=[
                    pl.BlockSpec((tm, K), lambda i: (i, 0)),
                    pl.BlockSpec((K, N), lambda i: (0, 0)),
                    pl.BlockSpec((1, N), lambda i: (0, 0)),
                ],
                out_specs=pl.BlockSpec((tm, N), lambda i: (i, 0)),
            ),
            compiler_params=pltpu.CompilerParams(
                dimension_semantics=("parallel",),
                vmem_limit_bytes=64 << 20,
            ),
        )(x2, wt, b2)

    return pl.pallas_call(
        _linear_kernel_acc,
        out_shape=out_shape,
        grid_spec=pltpu.PrefetchScalarGridSpec(
            num_scalar_prefetch=0,
            grid=(grid_m, grid_k),
            in_specs=[
                # Flattened activation: lane-dense (tm, tk) tiles, strided over K.
                pl.BlockSpec((tm, tk), lambda i, k: (i, k)),
                # Weight: (tk, N) tile, reused across batch tiles.
                pl.BlockSpec((tk, N), lambda i, k: (k, 0)),
                # Bias: single (1, N) resident block.
                pl.BlockSpec((1, N), lambda i, k: (0, 0)),
            ],
            out_specs=pl.BlockSpec((tm, N), lambda i, k: (i, 0)),
            scratch_shapes=[pltpu.VMEM((tm, N), jnp.float32)],
        ),
        compiler_params=pltpu.CompilerParams(
            # Batch tiles independent (shardable across TCs); K is the reduction axis.
            dimension_semantics=("parallel", "arbitrary"),
            vmem_limit_bytes=64 << 20,
        ),
    )(x2, wt, b2)


# ----------------------------------------------------------------------------------
# Self-test
# ----------------------------------------------------------------------------------
if __name__ == "__main__":
    key = jax.random.PRNGKey(0)
    kx, kw, kb = jax.random.split(key, 3)

    # Small NCHW feature map consistent with a branchynet classifier head:
    # B=2, C=4, H=16, W=16  ->  total_neurons = 1024, num_classes = 10
    B, C, H, W = 2, 4, 16, 16
    num_classes = 10
    total_neurons = C * H * W

    x = jax.random.normal(kx, (B, C, H, W), dtype=jnp.float32)
    weight = jax.random.normal(kw, (num_classes, total_neurons), dtype=jnp.float32) * 0.02
    bias = jax.random.normal(kb, (num_classes,), dtype=jnp.float32) * 0.02

    y = classifier_forward(x, weight, bias)
    y = jax.block_until_ready(y)

    # Reference: torch semantics  y = x.view(B, -1) @ W.T + b
    y_ref = x.reshape(B, -1) @ weight.T + bias

    assert y.shape == (B, num_classes), y.shape
    assert jnp.allclose(y, y_ref, rtol=1e-4, atol=1e-4), "Classifier kernel output mismatch"

    # Also exercise the K-tiled accumulator path (forced small tk) for coverage.
    y2 = jax.block_until_ready(classifier_forward(x, weight, bias, tk=256))
    assert jnp.allclose(y2, y_ref, rtol=1e-4, atol=1e-4), "K-tiled path output mismatch"

    print("KERNEL_OK")
</pallas_src>

<mosaic_0001>
module attributes {stable_mosaic.version = 11 : i64} {
  func.func @_linear_kernel_single(%arg0: i32, %arg1: memref<2x1024xf32, #tpu.memory_space<vmem>>, %arg2: memref<1024x10xf32, #tpu.memory_space<vmem>>, %arg3: memref<1x10xf32, #tpu.memory_space<vmem>>, %arg4: memref<2x10xf32, #tpu.memory_space<vmem>>) attributes {dimension_semantics = [#tpu.dimension_semantics<parallel>], iteration_bounds = array<i64: 1>, scalar_prefetch = 0 : i64, scratch_operands = 0 : i64, tpu.core_type = #tpu.core_type<tc>, window_params = [{transform_indices = @transform_0, window_bounds = array<i64: 2, 1024>}, {pipeline_mode = #tpu.pipeline_mode<synchronous>, transform_indices = @transform_1, window_bounds = array<i64: 1024, 10>}, {pipeline_mode = #tpu.pipeline_mode<synchronous>, transform_indices = @transform_2, window_bounds = array<i64: 1, 10>}, {transform_indices = @transform_3, window_bounds = array<i64: 2, 10>}]} {
    %c0 = arith.constant 0 : index
    %c0_0 = arith.constant 0 : index
    %0 = vector.load %arg1[%c0, %c0_0] : memref<2x1024xf32, #tpu.memory_space<vmem>>, vector<2x1024xf32>
    %c0_1 = arith.constant 0 : index
    %c0_2 = arith.constant 0 : index
    %1 = vector.load %arg2[%c0_1, %c0_2] : memref<1024x10xf32, #tpu.memory_space<vmem>>, vector<1024x10xf32>
    %cst = arith.constant dense<0.000000e+00> : vector<2x10xf32>
    %2 = tpu.matmul %0, %1, %cst {dimension_numbers = #tpu.dot_dimension_numbers<[1], [0], [0], [1], [0, 0, 1, 1], [], []>} : vector<2x1024xf32>, vector<1024x10xf32>, vector<2x10xf32> -> vector<2x10xf32>
    %c0_3 = arith.constant 0 : index
    %c0_4 = arith.constant 0 : index
    %3 = vector.load %arg3[%c0_3, %c0_4] : memref<1x10xf32, #tpu.memory_space<vmem>>, vector<1x10xf32>
    %4 = vector.broadcast %3 : vector<1x10xf32> to vector<2x10xf32>
    %5 = arith.addf %2, %4 : vector<2x10xf32>
    %c0_5 = arith.constant 0 : index
    %c0_6 = arith.constant 0 : index
    %6 = vector.load %arg4[%c0_5, %c0_6] : memref<2x10xf32, #tpu.memory_space<vmem>>, vector<2x10xf32>
    tpu.vector_store %arg4[%c0_5, %c0_6], %5 {strides = array<i32>} : memref<2x10xf32, #tpu.memory_space<vmem>>, vector<2x10xf32>,
    return
  }
  func.func @transform_0(%arg0: i32) -> (i32, i32) {
    %c0_i32 = arith.constant 0 : i32
    %c0_i32_0 = arith.constant 0 : i32
    return %arg0, %c0_i32 : i32, i32
  }
  func.func @transform_1(%arg0: i32) -> (i32, i32) {
    %c0_i32 = arith.constant 0 : i32
    %c0_i32_0 = arith.constant 0 : i32
    %c0_i32_1 = arith.constant 0 : i32
    return %c0_i32, %c0_i32_0 : i32, i32
  }
  func.func @transform_2(%arg0: i32) -> (i32, i32) {
    %c0_i32 = arith.constant 0 : i32
    %c0_i32_0 = arith.constant 0 : i32
    %c0_i32_1 = arith.constant 0 : i32
    return %c0_i32, %c0_i32_0 : i32, i32
  }
  func.func @transform_3(%arg0: i32) -> (i32, i32) {
    %c0_i32 = arith.constant 0 : i32
    %c0_i32_0 = arith.constant 0 : i32
    return %arg0, %c0_i32 : i32, i32
  }
}

</mosaic_0001>

<bundles_post_ra>
// kernel: tpu_custom_call.1
= control target key start
LH: loop header
LB: loop body
LE: loop exit
PB: predicated region body
PF: predicated region fallthrough
CT: control target
= control target key end

     0   :  { %s793_s0 = inlined_call_operand.vmem [shape: f32[2,1024], index: 0, kind: input, shape index: {}]   ;;  %s794_s1 = inlined_call_operand.vmem [shape: f32[1024,10], index: 1, kind: input, shape index: {}]   ;;  %s795_s2 = inlined_call_operand.vmem [shape: f32[1,10], index: 2, kind: input, shape index: {}]   ;;  %s796_s3 = inlined_call_operand.hbm [shape: f32[2,10], index: 3, kind: output, shape index: {}]  }
   0x1   :  { %v64_v0 = vld [vmem:[%s794_s1 + $0x178] sm:$0xff]  ;;  %v63_v2 = vld [vmem:[%s794_s1 + $0x170] sm:$0xff]  ;;  %v62_v6 = vld [vmem:[%s794_s1 + $0x168] sm:$0xff] }
   0x2   :  { %v32_v1 = vld [vmem:[%s794_s1 + $0x78] sm:$0xff]  ;;  %210 = vmatpush.msra.mxu2 %v64_v0  ;;  %v31_v4 = vld [vmem:[%s794_s1 + $0x70] sm:$0xff]  ;;  %v30_v8 = vld [vmem:[%s794_s1 + $0x68] sm:$0xff] }
   0x3   :  { %170 = vmatpush.msra.mxu0 %v32_v1  ;;  %v80_v3 = vld [vmem:[%s794_s1 + $0x1f8] sm:$0xff]  ;;  %v79_v7 = vld [vmem:[%s794_s1 + $0x1f0] sm:$0xff]  ;;  %v78_v10 = vld [vmem:[%s794_s1 + $0x1e8] sm:$0xff] }
   0x4   :  { %v48_v5 = vld [vmem:[%s794_s1 + $0xf8] sm:$0xff]  ;;  %230 = vmatpush.msra.mxu3 %v80_v3  ;;  %211 = vmatpush.msra.mxu2 %v63_v2  ;;  %v47_v9 = vld [vmem:[%s794_s1 + $0xf0] sm:$0xff]  ;;  %v61_v11 = vld [vmem:[%s794_s1 + $0x160] sm:$0xff] }
   0x5   :  { %190 = vmatpush.msra.mxu1 %v48_v5  ;;  %171 = vmatpush.msra.mxu0 %v31_v4  ;;  %v29_v12 = vld [vmem:[%s794_s1 + $0x60] sm:$0xff]  ;;  %v46_v13 = vld [vmem:[%s794_s1 + $0xe8] sm:$0xff]  ;;  %v60_v16 = vld [vmem:[%s794_s1 + $0x158] sm:$0xff] }
   0x6   :  { %231 = vmatpush.msra.mxu3 %v79_v7  ;;  %212 = vmatpush.msra.mxu2 %v62_v6  ;;  %v77_v14 = vld [vmem:[%s794_s1 + $0x1e0] sm:$0xff]  ;;  %v28_v17 = vld [vmem:[%s794_s1 + $0x58] sm:$0xff]  ;;  %v59_v20 = vld [vmem:[%s794_s1 + $0x150] sm:$0xff] }
   0x7   :  { %191 = vmatpush.msra.mxu1 %v47_v9  ;;  %172 = vmatpush.msra.mxu0 %v30_v8  ;;  %v45_v15 = vld [vmem:[%s794_s1 + $0xe0] sm:$0xff]  ;;  %v76_v18 = vld [vmem:[%s794_s1 + $0x1d8] sm:$0xff]  ;;  %v27_v21 = vld [vmem:[%s794_s1 + $0x50] sm:$0xff] }
   0x8   :  { %232 = vmatpush.msra.mxu3 %v78_v10  ;;  %213 = vmatpush.msra.mxu2 %v61_v11  ;;  %v44_v19 = vld [vmem:[%s794_s1 + $0xd8] sm:$0xff]  ;;  %v75_v22 = vld [vmem:[%s794_s1 + $0x1d0] sm:$0xff]  ;;  %v58_v24 = vld [vmem:[%s794_s1 + $0x148] sm:$0xff] }
   0x9   :  { %192 = vmatpush.msra.mxu1 %v46_v13  ;;  %173 = vmatpush.msra.mxu0 %v29_v12  ;;  %v43_v23 = vld [vmem:[%s794_s1 + $0xd0] sm:$0xff]  ;;  %v26_v25 = vld [vmem:[%s794_s1 + $0x48] sm:$0xff]  ;;  %v57_v28 = vld [vmem:[%s794_s1 + $0x140] sm:$0xff] }
   0xa   :  { %233 = vmatpush.msra.mxu3 %v77_v14  ;;  %214 = vmatpush.msra.mxu2 %v60_v16  ;;  %v74_v26 = vld [vmem:[%s794_s1 + $0x1c8] sm:$0xff]  ;;  %v25_v29 = vld [vmem:[%s794_s1 + $0x40] sm:$0xff]  ;;  %v56_v32 = vld [vmem:[%s794_s1 + $0x138] sm:$0xff] }
   0xb   :  { %193 = vmatpush.msra.mxu1 %v45_v15  ;;  %174 = vmatpush.msra.mxu0 %v28_v17  ;;  %v42_v27 = vld [vmem:[%s794_s1 + $0xc8] sm:$0xff]  ;;  %v73_v30 = vld [vmem:[%s794_s1 + $0x1c0] sm:$0xff]  ;;  %v24_v33 = vld [vmem:[%s794_s1 + $0x38] sm:$0xff] }
   0xc   :  { %234 = vmatpush.msra.mxu3 %v76_v18  ;;  %215 = vmatpush.msra.mxu2 %v59_v20  ;;  %v41_v31 = vld [vmem:[%s794_s1 + $0xc0] sm:$0xff]  ;;  %v72_v34 = vld [vmem:[%s794_s1 + $0x1b8] sm:$0xff]  ;;  %v55_v36 = vld [vmem:[%s794_s1 + $0x130] sm:$0xff] }
   0xd   :  { %194 = vmatpush.msra.mxu1 %v44_v19  ;;  %175 = vmatpush.msra.mxu0 %v27_v21  ;;  %v40_v35 = vld [vmem:[%s794_s1 + $0xb8] sm:$0xff]  ;;  %v23_v37 = vld [vmem:[%s794_s1 + $0x30] sm:$0xff]  ;;  %v54_v40 = vld [vmem:[%s794_s1 + $0x128] sm:$0xff] }
   0xe   :  { %235 = vmatpush.msra.mxu3 %v75_v22  ;;  %216 = vmatpush.msra.mxu2 %v58_v24  ;;  %v71_v38 = vld [vmem:[%s794_s1 + $0x1b0] sm:$0xff]  ;;  %v22_v41 = vld [vmem:[%s794_s1 + $0x28] sm:$0xff]  ;;  %v53_v44 = vld [vmem:[%s794_s1 + $0x120] sm:$0xff] }
   0xf   :  { %195 = vmatpush.msra.mxu1 %v43_v23  ;;  %176 = vmatpush.msra.mxu0 %v26_v25  ;;  %v39_v39 = vld [vmem:[%s794_s1 + $0xb0] sm:$0xff]  ;;  %v70_v42 = vld [vmem:[%s794_s1 + $0x1a8] sm:$0xff]  ;;  %v21_v45 = vld [vmem:[%s794_s1 + $0x20] sm:$0xff] }
  0x10   :  { %236 = vmatpush.msra.mxu3 %v74_v26  ;;  %217 = vmatpush.msra.mxu2 %v57_v28  ;;  %v38_v43 = vld [vmem:[%s794_s1 + $0xa8] sm:$0xff]  ;;  %v69_v46 = vld [vmem:[%s794_s1 + $0x1a0] sm:$0xff]  ;;  %v52_v48 = vld [vmem:[%s794_s1 + $0x118] sm:$0xff] }
  0x11   :  { %196 = vmatpush.msra.mxu1 %v42_v27  ;;  %177 = vmatpush.msra.mxu0 %v25_v29  ;;  %v37_v47 = vld [vmem:[%s794_s1 + $0xa0] sm:$0xff]  ;;  %v20_v49 = vld [vmem:[%s794_s1 + $0x18] sm:$0xff]  ;;  %v51_v52 = vld [vmem:[%s794_s1 + $0x110] sm:$0xff] }
  0x12   :  { %237 = vmatpush.msra.mxu3 %v73_v30  ;;  %218 = vmatpush.msra.mxu2 %v56_v32  ;;  %v68_v50 = vld [vmem:[%s794_s1 + $0x198] sm:$0xff]  ;;  %v19_v53 = vld [vmem:[%s794_s1 + $0x10] sm:$0xff]  ;;  %v50_v56 = vld [vmem:[%s794_s1 + $0x108] sm:$0xff] }
  0x13   :  { %197 = vmatpush.msra.mxu1 %v41_v31  ;;  %178 = vmatpush.msra.mxu0 %v24_v33  ;;  %v36_v51 = vld [vmem:[%s794_s1 + $0x98] sm:$0xff]  ;;  %v67_v54 = vld [vmem:[%s794_s1 + $0x190] sm:$0xff]  ;;  %v18_v57 = vld [vmem:[%s794_s1 + $0x8] sm:$0xff] }
  0x14   :  { %238 = vmatpush.msra.mxu3 %v72_v34  ;;  %219 = vmatpush.msra.mxu2 %v55_v36  ;;  %v35_v55 = vld [vmem:[%s794_s1 + $0x90] sm:$0xff]  ;;  %v66_v58 = vld [vmem:[%s794_s1 + $0x188] sm:$0xff]  ;;  %v49_v60 = vld [vmem:[%s794_s1 + $0x100] sm:$0xff] }
  0x15   :  { %198 = vmatpush.msra.mxu1 %v40_v35  ;;  %179 = vmatpush.msra.mxu0 %v23_v37  ;;  %v34_v59 = vld [vmem:[%s794_s1 + $0x88] sm:$0xff]  ;;  %v17_v61 = vld [vmem:[%s794_s1] sm:$0xff]  ;;  %v128_v62 = vld [vmem:[%s794_s1 + $0x378] sm:$0xff] }
  0x16   :  { %239 = vmatpush.msra.mxu3 %v71_v38  ;;  %220 = vmatpush.msra.mxu2 %v54_v40  ;;  %v65_v63 = vld [vmem:[%s794_s1 + $0x180] sm:$0xff]  ;;  %v96_v0 = vld [vmem:[%s794_s1 + $0x278] sm:$0xff]  ;;  %v127_v2 = vld [vmem:[%s794_s1 + $0x370] sm:$0xff] }
  0x17   :  { %199 = vmatpush.msra.mxu1 %v39_v39  ;;  %180 = vmatpush.msra.mxu0 %v22_v41  ;;  %v144_v1 = vld [vmem:[%s794_s1 + $0x3f8] sm:$0xff]  ;;  %v33_v3 = vld [vmem:[%s794_s1 + $0x80] sm:$0xff]  ;;  %v95_v4 = vld [vmem:[%s794_s1 + $0x270] sm:$0xff] }
  0x18   :  { %240 = vmatpush.msra.mxu3 %v70_v42  ;;  %221 = vmatpush.msra.mxu2 %v53_v44  ;;  %v112_v5 = vld [vmem:[%s794_s1 + $0x2f8] sm:$0xff]  ;;  %v126_v6 = vld [vmem:[%s794_s1 + $0x368] sm:$0xff]  ;;  %v143_v7 = vld [vmem:[%s794_s1 + $0x3f0] sm:$0xff] }
  0x19   :  { %200 = vmatpush.msra.mxu1 %v38_v43  ;;  %181 = vmatpush.msra.mxu0 %v21_v45  ;;  %v94_v8 = vld [vmem:[%s794_s1 + $0x268] sm:$0xff]  ;;  %v111_v9 = vld [vmem:[%s794_s1 + $0x2f0] sm:$0xff]  ;;  %v125_v10 = vld [vmem:[%s794_s1 + $0x360] sm:$0xff] }
  0x1a   :  { %241 = vmatpush.msra.mxu3 %v69_v46  ;;  %222 = vmatpush.msra.mxu2 %v52_v48  ;;  %v142_v11 = vld [vmem:[%s794_s1 + $0x3e8] sm:$0xff]  ;;  %v93_v12 = vld [vmem:[%s794_s1 + $0x260] sm:$0xff]  ;;  %v124_v15 = vld [vmem:[%s794_s1 + $0x358] sm:$0xff] }
  0x1b   :  { %201 = vmatpush.msra.mxu1 %v37_v47  ;;  %182 = vmatpush.msra.mxu0 %v20_v49  ;;  %v110_v13 = vld [vmem:[%s794_s1 + $0x2e8] sm:$0xff]  ;;  %v15_v14 = vld [vmem:[%s793_s0] sm:$0xff]  ;;  %v92_v17 = vld [vmem:[%s794_s1 + $0x258] sm:$0xff] }
  0x1c   :  { %242 = vmatpush.msra.mxu3 %v68_v50  ;;  %223 = vmatpush.msra.mxu2 %v51_v52  ;;  %v141_v16 = vld [vmem:[%s794_s1 + $0x3e0] sm:$0xff]  ;;  %151 = vst [vmem:[#allocation1] ss:$4 sm:$0xff] %v15_v14  ;;  %v123_v19 = vld [vmem:[%s794_s1 + $0x350] sm:$0xff]  ;;  %v140_v20 = vld [vmem:[%s794_s1 + $0x3d8] sm:$0xff] }
  0x1d   :  { %202 = vmatpush.msra.mxu1 %v36_v51  ;;  %183 = vmatpush.msra.mxu0 %v19_v53  ;;  %v109_v18 = vld [vmem:[%s794_s1 + $0x2e0] sm:$0xff]  ;;  %v91_v21 = vld [vmem:[%s794_s1 + $0x250] sm:$0xff]  ;;  %v108_v22 = vld [vmem:[%s794_s1 + $0x2d8] sm:$0xff] }
  0x1e   :  { %243 = vmatpush.msra.mxu3 %v67_v54  ;;  %224 = vmatpush.msra.mxu2 %v50_v56  ;;  %v122_v23 = vld [vmem:[%s794_s1 + $0x348] sm:$0xff]  ;;  %v139_v24 = vld [vmem:[%s794_s1 + $0x3d0] sm:$0xff]  ;;  %v121_v28 = vld [vmem:[%s794_s1 + $0x340] sm:$0xff] }
  0x1f   :  { %203 = vmatpush.msra.mxu1 %v35_v55  ;;  %184 = vmatpush.msra.mxu0 %v18_v57  ;;  %v16_v25 = vld [vmem:[%s793_s0 + $0x8] sm:$0xff]  ;;  %v107_v27 = vld [vmem:[%s794_s1 + $0x2d0] sm:$0xff]  ;;  %v89_v30 = vld [vmem:[%s794_s1 + $0x240] sm:$0xff] }
  0x20   :  { %244 = vmatpush.msra.mxu3 %v66_v58  ;;  %225 = vmatpush.msra.mxu2 %v49_v60  ;;  %v90_v26 = vld [vmem:[%s794_s1 + $0x248] sm:$0xff]  ;;  %153 = vst [vmem:[#allocation1 + $0x20] ss:$4 sm:$0xff] %v16_v25  ;;  %v120_v32 = vld [vmem:[%s794_s1 + $0x338] sm:$0xff]  ;;  %v137_v33 = vld [vmem:[%s794_s1 + $0x3c0] sm:$0xff] }
  0x21   :  { %204 = vmatpush.msra.mxu1 %v34_v59  ;;  %185 = vmatpush.msra.mxu0 %v17_v61  ;;  %v138_v29 = vld [vmem:[%s794_s1 + $0x3c8] sm:$0xff]  ;;  %v88_v34 = vld [vmem:[%s794_s1 + $0x238] sm:$0xff]  ;;  %v105_v35 = vld [vmem:[%s794_s1 + $0x2c0] sm:$0xff] }
  0x22   :  { %290 = vmatpush.msrb.mxu2 %v128_v62  ;;  %245 = vmatpush.msra.mxu3 %v65_v63  ;;  %v106_v31 = vld [vmem:[%s794_s1 + $0x2c8] sm:$0xff] }
  0x23   :  { %250 = vmatpush.msrb.mxu0 %v96_v0  ;;  %205 = vmatpush.msra.mxu1 %v33_v3 }
  0x24   :  { %310 = vmatpush.msrb.mxu3 %v144_v1  ;;  %291 = vmatpush.msrb.mxu2 %v127_v2 }
  0x25   :  { %251 = vmatpush.msrb.mxu0 %v95_v4  ;;  %270 = vmatpush.msrb.mxu1 %v112_v5 }
  0x26   :  { %292 = vmatpush.msrb.mxu2 %v126_v6  ;;  %311 = vmatpush.msrb.mxu3 %v143_v7 }
  0x27   :  { %252 = vmatpush.msrb.mxu0 %v94_v8  ;;  %271 = vmatpush.msrb.mxu1 %v111_v9 }
  0x28   :  { %293 = vmatpush.msrb.mxu2 %v125_v10  ;;  %312 = vmatpush.msrb.mxu3 %v142_v11 }
  0x29   :  { %253 = vmatpush.msrb.mxu0 %v93_v12  ;;  %272 = vmatpush.msrb.mxu1 %v110_v13 }
  0x2a   :  { %294 = vmatpush.msrb.mxu2 %v124_v15  ;;  %313 = vmatpush.msrb.mxu3 %v141_v16 }
  0x2b   :  { %254 = vmatpush.msrb.mxu0 %v92_v17  ;;  %273 = vmatpush.msrb.mxu1 %v109_v18 }
  0x2c   :  { %295 = vmatpush.msrb.mxu2 %v123_v19  ;;  %314 = vmatpush.msrb.mxu3 %v140_v20 }
  0x2d   :  { %255 = vmatpush.msrb.mxu0 %v91_v21  ;;  %274 = vmatpush.msrb.mxu1 %v108_v22 }
  0x2e   :  { %296 = vmatpush.msrb.mxu2 %v122_v23  ;;  %315 = vmatpush.msrb.mxu3 %v139_v24 }
  0x2f   :  { %256 = vmatpush.msrb.mxu0 %v90_v26  ;;  %275 = vmatpush.msrb.mxu1 %v107_v27 }
  0x30   :  { %297 = vmatpush.msrb.mxu2 %v121_v28  ;;  %316 = vmatpush.msrb.mxu3 %v138_v29 }
  0x31   :  { %8 = vsyncpa [#allocation3], 0  ;;  %257 = vmatpush.msrb.mxu0 %v89_v30  ;;  %276 = vmatpush.msrb.mxu1 %v106_v31  ;;  %v119_v36 = vld [vmem:[%s794_s1 + $0x330] sm:$0xff]  ;;  %v136_v37 = vld [vmem:[%s794_s1 + $0x3b8] sm:$0xff]  ;;  %s339_s4 = sshll.u32 %s796_s3, 4  ;;  %vm330_vm0 = vcmask 74752   ;;  %s340_s4 = int_to_ptr.hbm [resolvable:$true] %s339_s4 }
  0x32   :  { %298 = vmatpush.msrb.mxu2 %v120_v32  ;;  %317 = vmatpush.msrb.mxu3 %v137_v33  ;;  %v87_v38 = vld [vmem:[%s794_s1 + $0x230] sm:$0xff]  ;;  %v104_v39 = vld [vmem:[%s794_s1 + $0x2b8] sm:$0xff]  ;;  %v118_v40 = vld [vmem:[%s794_s1 + $0x328] sm:$0xff] }
  0x33   :  { %258 = vmatpush.msrb.mxu0 %v88_v34  ;;  %277 = vmatpush.msrb.mxu1 %v105_v35  ;;  %v135_v41 = vld [vmem:[%s794_s1 + $0x3b0] sm:$0xff]  ;;  %v86_v42 = vld [vmem:[%s794_s1 + $0x228] sm:$0xff]  ;;  %v117_v44 = vld [vmem:[%s794_s1 + $0x320] sm:$0xff] }
  0x34   :  { %299 = vmatpush.msrb.mxu2 %v119_v36  ;;  %318 = vmatpush.msrb.mxu3 %v136_v37  ;;  %v103_v43 = vld [vmem:[%s794_s1 + $0x2b0] sm:$0xff]  ;;  %v134_v45 = vld [vmem:[%s794_s1 + $0x3a8] sm:$0xff]  ;;  %v85_v47 = vld [vmem:[%s794_s1 + $0x220] sm:$0xff] }
  0x35   :  { %259 = vmatpush.msrb.mxu0 %v87_v38  ;;  %278 = vmatpush.msrb.mxu1 %v104_v39  ;;  %v156_v46 = vld.sshfl [vmem:[#allocation1 + $0x10] sm:$0xff pattern:$0x73625140]  ;;  %v102_v48 = vld [vmem:[%s794_s1 + $0x2a8] sm:$0xff]  ;;  %v116_v49 = vld [vmem:[%s794_s1 + $0x318] sm:$0xff] }
  0x36   :  { %300 = vmatpush.msrb.mxu2 %v118_v40  ;;  %319 = vmatpush.msrb.mxu3 %v135_v41  ;;  %v133_v50 = vld [vmem:[%s794_s1 + $0x3a0] sm:$0xff]  ;;  %v157_v52 = vld.sshfl [vmem:[#allocation1 + $0x18] sm:$0xff pattern:$0x73625140]  ;;  %v115_v55 = vld [vmem:[%s794_s1 + $0x310] sm:$0xff] }
  0x37   :  { %260 = vmatpush.msrb.mxu0 %v86_v42  ;;  %279 = vmatpush.msrb.mxu1 %v103_v43  ;;  %v154_v51 = vld.sshfl [vmem:[#allocation1] sm:$0xff pattern:$0x73625140]  ;;  %v84_v53 = vld [vmem:[%s794_s1 + $0x218] sm:$0xff]  ;;  %v83_v58 = vld [vmem:[%s794_s1 + $0x210] sm:$0xff] }
  0x38   :  { %301 = vmatpush.msrb.mxu2 %v117_v44  ;;  %320 = vmatpush.msrb.mxu3 %v134_v45  ;;  %v101_v54 = vld [vmem:[%s794_s1 + $0x2a0] sm:$0xff]  ;;  %v132_v56 = vld [vmem:[%s794_s1 + $0x398] sm:$0xff]  ;;  %v155_v57 = vld.sshfl [vmem:[#allocation1 + $0x8] sm:$0xff pattern:$0x73625140] }
  0x39   :  { %226 = vmatmul.f32.vlgmr.msra.gmra.mxu2 %v156_v46  ;;  %261 = vmatpush.msrb.mxu0 %v85_v47  ;;  %v100_v59 = vld [vmem:[%s794_s1 + $0x298] sm:$0xff]  ;;  %v114_v60 = vld [vmem:[%s794_s1 + $0x308] sm:$0xff]  ;;  %v131_v61 = vld [vmem:[%s794_s1 + $0x390] sm:$0xff] }
  0x3a   :  { %280 = vmatpush.msrb.mxu1 %v102_v48  ;;  %302 = vmatpush.msrb.mxu2 %v116_v49  ;;  %v82_v62 = vld [vmem:[%s794_s1 + $0x208] sm:$0xff]  ;;  %v99_v63 = vld [vmem:[%s794_s1 + $0x290] sm:$0xff]  ;;  %v113_v0 = vld [vmem:[%s794_s1 + $0x300] sm:$0xff] }
  0x3b   :  { %321 = vmatpush.msrb.mxu3 %v133_v50  ;;  %186 = vmatmul.f32.vlgmr.msra.gmra.mxu0 %v154_v51  ;;  %v130_v1 = vld [vmem:[%s794_s1 + $0x388] sm:$0xff]  ;;  %v160_v2 = vld.sshfl [vmem:[#allocation1 + $0x30] sm:$0xff pattern:$0x73625140]  ;;  %v81_v3 = vld [vmem:[%s794_s1 + $0x200] sm:$0xff] }
  0x3c   :  { %246 = vmatmul.f32.vlgmr.msra.gmra.mxu3 %v157_v52  ;;  %262 = vmatpush.msrb.mxu0 %v84_v53  ;;  %v98_v4 = vld [vmem:[%s794_s1 + $0x288] sm:$0xff]  ;;  %v129_v5 = vld [vmem:[%s794_s1 + $0x380] sm:$0xff]  ;;  %v161_v7 = vld.sshfl [vmem:[#allocation1 + $0x38] sm:$0xff pattern:$0x73625140] }
  0x3d   :  { %281 = vmatpush.msrb.mxu1 %v101_v54  ;;  %303 = vmatpush.msrb.mxu2 %v115_v55  ;;  %v158_v6 = vld.sshfl [vmem:[#allocation1 + $0x20] sm:$0xff pattern:$0x73625140]  ;;  %v159_v9 = vld.sshfl [vmem:[#allocation1 + $0x28] sm:$0xff pattern:$0x73625140] }
  0x3e   :  { %322 = vmatpush.msrb.mxu3 %v132_v56  ;;  %206 = vmatmul.f32.vlgmr.msra.gmra.mxu1 %v155_v57  ;;  %v97_v8 = vld [vmem:[%s794_s1 + $0x280] sm:$0xff]  ;;  %s376_s1 = smov [#allocation2]  }
  0x3f   :  { %263 = vmatpush.msrb.mxu0 %v83_v58  ;;  %282 = vmatpush.msrb.mxu1 %v100_v59  ;;  %v349_v10 = vld [vmem:[%s795_s2] ss:$0 sm:$0xff]  ;;  %s337_s28 = sshll.u32 %s376_s1, 4  ;;  %s338_s28 = int_to_ptr.vmem [resolvable:$true] %s337_s28 }
  0x40   :  { %304 = vmatpush.msrb.mxu2 %v114_v60  ;;  %323 = vmatpush.msrb.mxu3 %v131_v61 }
  0x41   :  { %264 = vmatpush.msrb.mxu0 %v82_v62  ;;  %283 = vmatpush.msrb.mxu1 %v99_v63 }
  0x42   :  { %305 = vmatpush.msrb.mxu2 %v113_v0  ;;  %324 = vmatpush.msrb.mxu3 %v130_v1 }
  0x43   :  { %306 = vmatmul.f32.vlgmr.msrb.gmra.mxu2 %v160_v2  ;;  %265 = vmatpush.msrb.mxu0 %v81_v3 }
  0x44   :  { %284 = vmatpush.msrb.mxu1 %v98_v4  ;;  %325 = vmatpush.msrb.mxu3 %v129_v5 }
  0x45   :  { %266 = vmatmul.f32.vlgmr.msrb.gmra.mxu0 %v158_v6  ;;  %326 = vmatmul.f32.vlgmr.msrb.gmra.mxu3 %v161_v7 }
  0x46   :  { %285 = vmatpush.msrb.mxu1 %v97_v8 }
  0x47   :  { %286 = vmatmul.f32.vlgmr.msrb.gmra.mxu1 %v159_v9 }
  0xb8   :  { %v187_v11 = vpop.f32.mrf.mxu0 }
  0xb9   :  { %v188_v12 = vadd.f32 %v349_v10, %v187_v11 }
  0xbb   :  { %v207_v13 = vpop.f32.mrf.mxu1 }
  0xbc   :  { %v208_v14 = vadd.f32 %v207_v13, %v188_v12  ;;  %v227_v15 = vpop.f32.mrf.mxu2 }
  0xbe   :  { %v228_v16 = vadd.f32 %v227_v15, %v208_v14 }
  0xbf   :  { %v247_v17 = vpop.f32.mrf.mxu3 }
  0xc0   :  { %v248_v18 = vadd.f32 %v247_v17, %v228_v16 }
  0xc2   :  { %v267_v19 = vpop.f32.mrf.mxu0 }
  0xc3   :  { %v268_v20 = vadd.f32 %v267_v19, %v248_v18 }
  0xc4   :  { %v287_v21 = vpop.f32.mrf.mxu1 }
  0xc5   :  { %v288_v22 = vadd.f32 %v287_v21, %v268_v20 }
  0xc6   :  { %v307_v23 = vpop.f32.mrf.mxu2 }
  0xc7   :  { %v308_v24 = vadd.f32 %v307_v23, %v288_v22 }
  0xc8   :  { %v327_v25 = vpop.f32.mrf.mxu3 }
  0xc9   :  { %v328_v26 = vadd.f32 %v327_v25, %v308_v24 }
  0xcb   :  { %331 = vst.msk [vmem:[#allocation2] sm:$0x3] %vm330_vm0, %v328_v26 }
  0xcc   :  { %342 = dma.vmem_to_hbm [thread:$0]  %s338_s28, 32, %s340_s4, [#allocation3]  }
  0xcd   :  { %374 = dma.done.wait [#allocation3], 32  }
  0xce   :  { %375 = vsyncadd [#allocation3], 4294967264 }
  0xcf   :  { %347 = vsyncpa [#allocation3], 1 }

</bundles_post_ra>
